<compile_context>
chip_gen: v7x
topology: tpu7x:2x2x1
jax: 0.10.0
libtpu: 0.0.40
codegen_flags: <defaults>
</compile_context>

<pallas_src>
import functools

import jax
import jax.numpy as jnp
from jax.experimental import pallas as pl
from jax.experimental.pallas import tpu as pltpu

D_IN = 512
D_HID = 4096
D_OUT = 128
TK = 512            # hidden-dimension chunk per grid step (4096 / 512 = 8 steps)
MAX_BLOCK_B = 256   # batch-tile cap (128 would suffice on v5e)


def _encode_fc_kernel(x_ref, w1_ref, b1_ref, w2_ref, b2_ref, o_ref, acc_ref):
    # x_ref:   (TB, 512)    f32  VMEM (same tile revisited across k)
    # w1_ref:  (512, TK)    bf16 VMEM (streamed over hidden chunks)
    # b1_ref:  (1, TK)      f32  VMEM
    # w2_ref:  (TK, 128)    bf16 VMEM (streamed over hidden chunks)
    # b2_ref:  (1, 128)     f32  VMEM
    # o_ref:   (TB, 128)    f32  VMEM
    # acc_ref: (TB, 128)    f32  VMEM scratch accumulator
    k = pl.program_id(1)

    @pl.when(k == 0)
    def _():
        acc_ref[...] = jnp.zeros_like(acc_ref)

    # First Linear chunk + ReLU (bf16 x bf16 -> f32 on the MXU).
    x = x_ref[...].astype(w1_ref.dtype)
    h = jnp.dot(x, w1_ref[...], preferred_element_type=jnp.float32)
    h = jnp.maximum(h + b1_ref[...], 0.0)

    # Second Linear chunk, accumulated in f32 scratch.
    acc_ref[...] += jnp.dot(h.astype(w2_ref.dtype), w2_ref[...],
                            preferred_element_type=jnp.float32)

    # Finalize: output bias + sigmoid (EUP) once, on the last hidden chunk.
    @pl.when(k == pl.num_programs(1) - 1)
    def _():
        o_ref[...] = jax.nn.sigmoid(acc_ref[...] + b2_ref[...]).astype(o_ref.dtype)


def _round_up(n, m):
    return ((n + m - 1) // m) * m


@functools.partial(jax.jit, static_argnames=("block_b",))
def _encode_fc_call(x, w1, b1, w2, b2, *, block_b):
    B = x.shape[0]
    grid = (B // block_b, D_HID // TK)
    return pl.pallas_call(
        _encode_fc_kernel,
        out_shape=jax.ShapeDtypeStruct((B, D_OUT), jnp.float32),
        grid_spec=pltpu.PrefetchScalarGridSpec(
            num_scalar_prefetch=0,
            grid=grid,
            in_specs=[
                pl.BlockSpec((block_b, D_IN), lambda i, k: (i, 0)),   # x tile
                pl.BlockSpec((D_IN, TK), lambda i, k: (0, k)),        # W1 chunk
                pl.BlockSpec((1, TK), lambda i, k: (0, k)),           # b1 chunk
                pl.BlockSpec((TK, D_OUT), lambda i, k: (k, 0)),       # W2 chunk
                pl.BlockSpec((1, D_OUT), lambda i, k: (0, 0)),        # b2
            ],
            out_specs=pl.BlockSpec((block_b, D_OUT), lambda i, k: (i, 0)),
            scratch_shapes=[pltpu.VMEM((block_b, D_OUT), jnp.float32)],
        ),
        compiler_params=pltpu.CompilerParams(
            dimension_semantics=("parallel", "arbitrary"),
        ),
    )(x, w1, b1, w2, b2)


def encode_fc(x, w1, b1, w2, b2, *, block_b=None):
    """y = sigmoid(relu(x @ w1 + b1) @ w2 + b2); x: [B, 512] float32."""
    B, d_in = x.shape
    assert d_in == D_IN
    if block_b is None:
        block_b = min(MAX_BLOCK_B, _round_up(B, 8))
    pad = (-B) % block_b
    if pad:
        x = jnp.pad(x, ((0, pad), (0, 0)))
    out = _encode_fc_call(x, w1, b1, w2, b2, block_b=block_b)
    return out[:B]


def init_params(key, weights_dtype=jnp.bfloat16):
    """nn.Linear-style init U(-1/sqrt(fan_in), 1/sqrt(fan_in)).

    Returns (f32 master params, kernel params with bf16 weights)."""
    k1, k2, k3, k4 = jax.random.split(key, 4)
    bound1 = 1.0 / jnp.sqrt(float(D_IN))
    bound2 = 1.0 / jnp.sqrt(float(D_HID))
    w1 = jax.random.uniform(k1, (D_IN, D_HID), jnp.float32, -bound1, bound1)
    b1 = jax.random.uniform(k2, (1, D_HID), jnp.float32, -bound1, bound1)
    w2 = jax.random.uniform(k3, (D_HID, D_OUT), jnp.float32, -bound2, bound2)
    b2 = jax.random.uniform(k4, (1, D_OUT), jnp.float32, -bound2, bound2)
    params_f32 = (w1, b1, w2, b2)
    params_kernel = (w1.astype(weights_dtype), b1, w2.astype(weights_dtype), b2)
    return params_f32, params_kernel


def reference(x, w1, b1, w2, b2):
    h = jnp.maximum(x @ w1 + b1, 0.0)
    return jax.nn.sigmoid(h @ w2 + b2)


if __name__ == "__main__":
    key = jax.random.PRNGKey(0)
    kx, kp = jax.random.split(key)

    params_f32, params_bf16 = init_params(kp)

    # Small batches: B=8 (single tile) and B=20 (exercises pad-to-tile);
    # both sweep the full 8-step hidden-chunk reduction axis.
    for B in (8, 20):
        x = jax.random.normal(jax.random.fold_in(kx, B), (B, D_IN), jnp.float32)
        out = jax.block_until_ready(encode_fc(x, *params_bf16))
        ref = reference(x, *params_f32)
        assert out.shape == (B, D_OUT), out.shape
        err = float(jnp.max(jnp.abs(out - ref)))
        # Tolerance loosened for bf16 weights vs the f32 reference.
        assert err < 2e-2, err

    print("KERNEL_OK")
</pallas_src>

<mosaic_0001>
module attributes {stable_mosaic.version = 11 : i64} {
  func.func @_encode_fc_kernel(%arg0: i32, %arg1: i32, %arg2: memref<8x512xf32, #tpu.memory_space<vmem>>, %arg3: memref<512x512xbf16, #tpu.memory_space<vmem>>, %arg4: memref<1x512xf32, #tpu.memory_space<vmem>>, %arg5: memref<512x128xbf16, #tpu.memory_space<vmem>>, %arg6: memref<1x128xf32, #tpu.memory_space<vmem>>, %arg7: memref<8x128xf32, #tpu.memory_space<vmem>>, %arg8: memref<8x128xf32, #tpu.memory_space<vmem>>) attributes {dimension_semantics = [#tpu.dimension_semantics<parallel>, #tpu.dimension_semantics<arbitrary>], iteration_bounds = array<i64: 1, 8>, scalar_prefetch = 0 : i64, scratch_operands = 1 : i64, tpu.core_type = #tpu.core_type<tc>, window_params = [{transform_indices = @transform_0, window_bounds = array<i64: 8, 512>}, {transform_indices = @transform_1, window_bounds = array<i64: 512, 512>}, {transform_indices = @transform_2, window_bounds = array<i64: 1, 512>}, {transform_indices = @transform_3, window_bounds = array<i64: 512, 128>}, {pipeline_mode = #tpu.pipeline_mode<synchronous>, transform_indices = @transform_4, window_bounds = array<i64: 1, 128>}, {transform_indices = @transform_5, window_bounds = array<i64: 8, 128>}]} {
    %c0_i32 = arith.constant 0 : i32
    %0 = arith.cmpi eq, %arg1, %c0_i32 : i32
    %1 = arith.extui %0 : i1 to i32
    %c0_i32_0 = arith.constant 0 : i32
    %2 = arith.cmpi ne, %1, %c0_i32_0 : i32
    scf.if %2 {
      %cst_15 = arith.constant 0.000000e+00 : f32
      %21 = vector.broadcast %cst_15 : f32 to vector<8x128xf32>
      %c0_16 = arith.constant 0 : index
      %c0_17 = arith.constant 0 : index
      %22 = vector.load %arg8[%c0_16, %c0_17] : memref<8x128xf32, #tpu.memory_space<vmem>>, vector<8x128xf32>
      tpu.vector_store %arg8[%c0_16, %c0_17], %21 {strides = array<i32>} : memref<8x128xf32, #tpu.memory_space<vmem>>, vector<8x128xf32>,
    } else {
    }
    %c0 = arith.constant 0 : index
    %c0_1 = arith.constant 0 : index
    %3 = vector.load %arg2[%c0, %c0_1] : memref<8x512xf32, #tpu.memory_space<vmem>>, vector<8x512xf32>
    %4 = arith.truncf %3 : vector<8x512xf32> to vector<8x512xbf16>
    %c0_2 = arith.constant 0 : index
    %c0_3 = arith.constant 0 : index
    %5 = vector.load %arg3[%c0_2, %c0_3] : memref<512x512xbf16, #tpu.memory_space<vmem>>, vector<512x512xbf16>
    %cst = arith.constant dense<0.000000e+00> : vector<8x512xf32>
    %6 = tpu.matmul %4, %5, %cst {dimension_numbers = #tpu.dot_dimension_numbers<[1], [0], [0], [1], [0, 0, 1, 1], [], []>} : vector<8x512xbf16>, vector<512x512xbf16>, vector<8x512xf32> -> vector<8x512xf32>
    %c0_4 = arith.constant 0 : index
    %c0_5 = arith.constant 0 : index
    %7 = vector.load %arg4[%c0_4, %c0_5] : memref<1x512xf32, #tpu.memory_space<vmem>>, vector<1x512xf32>
    %8 = vector.broadcast %7 : vector<1x512xf32> to vector<8x512xf32>
    %9 = arith.addf %6, %8 : vector<8x512xf32>
    %cst_6 = arith.constant 0.000000e+00 : f32
    %10 = vector.broadcast %cst_6 : f32 to vector<8x512xf32>
    %11 = arith.maximumf %9, %10 : vector<8x512xf32>
    %c0_7 = arith.constant 0 : index
    %c0_8 = arith.constant 0 : index
    %12 = vector.load %arg8[%c0_7, %c0_8] : memref<8x128xf32, #tpu.memory_space<vmem>>, vector<8x128xf32>
    %13 = arith.truncf %11 : vector<8x512xf32> to vector<8x512xbf16>
    %c0_9 = arith.constant 0 : index
    %c0_10 = arith.constant 0 : index
    %14 = vector.load %arg5[%c0_9, %c0_10] : memref<512x128xbf16, #tpu.memory_space<vmem>>, vector<512x128xbf16>
    %cst_11 = arith.constant dense<0.000000e+00> : vector<8x128xf32>
    %15 = tpu.matmul %13, %14, %cst_11 {dimension_numbers = #tpu.dot_dimension_numbers<[1], [0], [0], [1], [0, 0, 1, 1], [], []>} : vector<8x512xbf16>, vector<512x128xbf16>, vector<8x128xf32> -> vector<8x128xf32>
    %16 = arith.addf %12, %15 : vector<8x128xf32>
    %c0_12 = arith.constant 0 : index
    %c0_13 = arith.constant 0 : index
    %17 = vector.load %arg8[%c0_12, %c0_13] : memref<8x128xf32, #tpu.memory_space<vmem>>, vector<8x128xf32>
    tpu.vector_store %arg8[%c0_12, %c0_13], %16 {strides = array<i32>} : memref<8x128xf32, #tpu.memory_space<vmem>>, vector<8x128xf32>,
    %c7_i32 = arith.constant 7 : i32
    %18 = arith.cmpi eq, %arg1, %c7_i32 : i32
    %19 = arith.extui %18 : i1 to i32
    %c0_i32_14 = arith.constant 0 : i32
    %20 = arith.cmpi ne, %19, %c0_i32_14 : i32
    scf.if %20 {
      %c0_15 = arith.constant 0 : index
      %c0_16 = arith.constant 0 : index
      %21 = vector.load %arg8[%c0_15, %c0_16] : memref<8x128xf32, #tpu.memory_space<vmem>>, vector<8x128xf32>
      %c0_17 = arith.constant 0 : index
      %c0_18 = arith.constant 0 : index
      %22 = vector.load %arg6[%c0_17, %c0_18] : memref<1x128xf32, #tpu.memory_space<vmem>>, vector<1x128xf32>
      %23 = vector.broadcast %22 : vector<1x128xf32> to vector<8x128xf32>
      %24 = arith.addf %21, %23 : vector<8x128xf32>
      %25 = arith.negf %24 : vector<8x128xf32>
      %26 = math.exp %25 : vector<8x128xf32>
      %cst_19 = arith.constant 1.000000e+00 : f32
      %27 = vector.broadcast %cst_19 : f32 to vector<8x128xf32>
      %28 = arith.addf %27, %26 : vector<8x128xf32>
      %29 = arith.divf %27, %28 : vector<8x128xf32>
      %c0_20 = arith.constant 0 : index
      %c0_21 = arith.constant 0 : index
      %30 = vector.load %arg7[%c0_20, %c0_21] : memref<8x128xf32, #tpu.memory_space<vmem>>, vector<8x128xf32>
      tpu.vector_store %arg7[%c0_20, %c0_21], %29 {strides = array<i32>} : memref<8x128xf32, #tpu.memory_space<vmem>>, vector<8x128xf32>,
    } else {
    }
    return
  }
  func.func @transform_0(%arg0: i32, %arg1: i32) -> (i32, i32) {
    %c0_i32 = arith.constant 0 : i32
    %c0_i32_0 = arith.constant 0 : i32
    return %arg0, %c0_i32 : i32, i32
  }
  func.func @transform_1(%arg0: i32, %arg1: i32) -> (i32, i32) {
    %c0_i32 = arith.constant 0 : i32
    %c0_i32_0 = arith.constant 0 : i32
    return %c0_i32, %arg1 : i32, i32
  }
  func.func @transform_2(%arg0: i32, %arg1: i32) -> (i32, i32) {
    %c0_i32 = arith.constant 0 : i32
    %c0_i32_0 = arith.constant 0 : i32
    return %c0_i32, %arg1 : i32, i32
  }
  func.func @transform_3(%arg0: i32, %arg1: i32) -> (i32, i32) {
    %c0_i32 = arith.constant 0 : i32
    %c0_i32_0 = arith.constant 0 : i32
    return %arg1, %c0_i32 : i32, i32
  }
  func.func @transform_4(%arg0: i32, %arg1: i32) -> (i32, i32) {
    %c0_i32 = arith.constant 0 : i32
    %c0_i32_0 = arith.constant 0 : i32
    %c0_i32_1 = arith.constant 0 : i32
    return %c0_i32, %c0_i32_0 : i32, i32
  }
  func.func @transform_5(%arg0: i32, %arg1: i32) -> (i32, i32) {
    %c0_i32 = arith.constant 0 : i32
    %c0_i32_0 = arith.constant 0 : i32
    return %arg0, %c0_i32 : i32, i32
  }
}

</mosaic_0001>

<bundles_post_ra>
// kernel: _encode_fc_call.1
= control target key start
LH: loop header
LB: loop body
LE: loop exit
PB: predicated region body
PF: predicated region fallthrough
CT: control target
= control target key end

     0   :  { %s3135_s0 = inlined_call_operand.hbm [shape: f32[8,512], index: 0, kind: input, shape index: {}]   ;;  %s3136_s1 = inlined_call_operand.hbm [shape: bf16[512,4096], index: 1, kind: input, shape index: {}]   ;;  %s3137_s2 = inlined_call_operand.hbm [shape: f32[1,4096], index: 2, kind: input, shape index: {}]   ;;  %s3138_s3 = inlined_call_operand.hbm [shape: bf16[4096,128], index: 3, kind: input, shape index: {}]   ;;  %s3139_s4 = inlined_call_operand.hbm [shape: f32[1,128], index: 4, kind: input, shape index: {}]   ;;  %s3140_s5 = inlined_call_operand.hbm [shape: f32[8,128], index: 5, kind: output, shape index: {}]  }
   0x1   :  { %3154 = sst [smem:[#allocation21_spill]] %s3136_s1 }
   0x2   :  { %3155 = sst [smem:[#allocation22_spill]] %s3139_s4 }
   0x3   :  { %10 = vsyncpa [#allocation4], 0 }
   0x4   :  { %11 = vsyncpa [#allocation7], 0 }
   0x5   :  { %13 = vsyncpa [#allocation7 + $0x1], 0 }
   0x6   :  { %14 = vsyncpa [#allocation10], 0 }
   0x7   :  { %16 = vsyncpa [#allocation10 + $0x1], 0 }
   0x8   :  { %17 = vsyncpa [#allocation5], 0  ;;  %s2686_s18 = smov 0   ;;  %s2688_s19 = smov 0  }
   0x9   :  { %s2690_s20 = smov 0   ;;  %s2692_s21 = smov 0  }
   0xa   :  { %s2694_s22 = smov 0   ;;  %s2696_s23 = smov 0  }
   0xb LB: > { %3156 = sst [smem:[#allocation18_spill]] %s2630_s20  ;;  %s2715_s24 = sadd.s32 4294967295, %s2642_s23   ;;  %s2642_s23 = sphi %s2696_s23, %s23_s23   ;;  %s2638_s22 = sphi %s2694_s22, %s3185_s22   ;;  %s2634_s21 = sphi %s2692_s21, %s3184_s21   ;;  %s2630_s20 = sphi %s2690_s20, %s3180_s20   ;;  %s2626_s19 = sphi %s2688_s19, %s3183_s19   ;;  %s2622_s18 = sphi %s2686_s18, %s3182_s18  }
   0xc   : > { %s68_s25 = sadd.s32 1, %s2630_s20  ;;  %p75_p0 = scmp.ne.s32.totalorder %s2630_s20, %s2626_s19 }
   0xd   : > { %p76_p1 = scmp.eq.s32.totalorder %s2642_s23, 0  ;;  %p81_p2 = scmp.ne.s32.totalorder %s2626_s19, %s2622_s18 }
   0xe   : > { %p3141_p3 = scmp.eq.s32.totalorder %s2715_s24, 0  ;;  %p1831_p5 = scmp.ge.s32.totalorder %s2642_s23, 1 }
   0xf   : > { %p77_p4 = por %p76_p1, %p75_p0  ;;  %p191_p7 = scmp.lt.s32.totalorder %s2642_s23, 9 }
  0x10   : > { %p2726_p6 = por %p3141_p3, %p81_p2  ;;  %s2644_s28 = smov [#allocation11]  }
  0x11   : > { %p2731_p8 = pnand %p1831_p5, %p191_p7  ;;  %s218_s29 = sshll.u32 %s2644_s28, 4  ;;  %s219_s29 = int_to_ptr.vmem [resolvable:$true] %s218_s29 }
  0x12   : > { %s3157_s26 = scalar_select %p2726_p6, 1, 0 }
  0x13   : > { %s3158_s27 = scalar_select %p2731_p8, 1, 0 }
  0x14   : > { %p2095_p9 = pneg %p2731_p8  ;;  %p2114_p10 = scmp.lt.s32.totalorder %s2642_s23, 8 }
  0x15   : > { %s3148_s30 = sand.u32 1, %s2642_s23   ;;  %s3161_s4 = sld [smem:[#allocation22_spill]] }
  0x16   : > { %p2741_p11 = pnand %p2095_p9, %p3141_p3  ;;  %p2745_p12 = pnand %p2114_p10, %p77_p4 }
  0x18   : > { %s3159_s6 = scalar_select %p2741_p11, 1, 0 }
  0x19   : > { %s3160_s7 = scalar_select %p2745_p12, 1, 0 }
  0x1a   : > { %p3145_p0 = pneg %p2741_p11 }
  0x1b   : > { %s2404_s10 = scalar_lea.hbm %s3161_s4, 16 }
  0x1c   : > { %p2405_p13 = scmp.ne.s32.totalorder %s3161_s4, %s2404_s10  ;;  %p2411_p4 = scmp.lt.u32.totalorder %s2404_s10, %s3161_s4 }
  0x1e   : > { %p2407_p1 = pnand %p3145_p0, %p2405_p13 }
  0x20   : > { %p2408_p2 = pneg %p2407_p1 }
  0x22   : > { %p2413_p5 = pnand %p2411_p4, %p2408_p2 }
  0x24   : > { %2416 = shalt.err (!%p2413_p5)
}
  0x25   : > { %s2417_s15 = scalar_lea.vmem %s219_s29, 16  ;;  %s2424_s16 = scalar_lea.vmem %s219_s29, 32 }
  0x26   : > { %p2418_p7 = scmp.ne.s32.totalorder %s219_s29, %s2417_s15  ;;  %p2425_p3 = scmp.lt.s32.totalorder %s219_s29, %s219_s29 }
  0x27   : > { %p2426_p6 = scmp.lt.s32.totalorder %s2424_s16, %s2417_s15 }
  0x28   : > { %p2420_p9 = pnand %p2418_p7, %p3145_p0 }
  0x29   : > { %p2427_p8 = por %p2426_p6, %p2425_p3 }
  0x2a   : > { %p2421_p10 = pneg %p2420_p9 }
  0x2c   : > { %p2428_p12 = pnand %p2427_p8, %p2421_p10 }
  0x2e   : > { %2431 = shalt.err (!%p2428_p12)
}
  0x2f   : > { %2101 = dma.hbm_to_vmem [thread:$0]  (!%p2741_p11), %s3161_s4, 16, %s219_s29, [#allocation10]  }
  0x30   : > { %s32_s28 = sadd.s32 1, %s2638_s22  ;;  %s2773_s8 = sand.u32 1, %s2630_s20  }
  0x31   : > { %p33_p3 = scmp.ge.s32.totalorder %s32_s28, 8  ;;  %s1835_s9 = sshll.u32 %s2773_s8, 10 }
  0x32   : > { %s2018_s10 = sshll.u32 %s2638_s22, 8  ;;  %s3163_s1 = sld [smem:[#allocation21_spill]] }
  0x33   : > { %s3187_s28 = smov (%p33_p3, %s32_s28), 0  ;;  %s233_s29 = scalar_lea.vmem [#allocation6], %s1835_s9 }
  0x34   : > { %3162 = sst [smem:[#allocation19_spill]] %s3187_s28  ;;  %s240_s14 = sshll.u32 %s233_s29, 4  ;;  %s2786_s14 = int_to_ptr.vmem [resolvable:$true] %s240_s14 }
  0x35   : > { %s65_s15 = ssub.s32 %s2638_s22, %s3187_s28  ;;  %s2795_s17 = scalar_lea.sflag [#allocation7], %s3148_s30 }
  0x36   : > { %p66_p6 = scmp.eq.s32.totalorder %s65_s15, 0  ;;  %p3165_p12 = scmp.ne.s32.totalorder %s3160_s7, 0 }
  0x38   : > { %s2782_s13 = scalar_lea.hbm %s3163_s1, %s2018_s10  ;;  %p2801_p13 = pneg %p3165_p12 }
  0x39   : > { %s2791_s16 = scalar_select %p66_p6, %s2630_s20, %s68_s25  }
  0x3a   : > { %s2432_s18 = scalar_lea.hbm %s2782_s13, 16384  ;;  %s2437_s12 = scalar_lea.hbm %s3163_s1, 131072 }
  0x3b   : > { %3164 = sst [smem:[#allocation20_spill]] %s2791_s16  ;;  %p2433_p8 = scmp.ne.s32.totalorder %s2782_s13, %s2432_s18 }
  0x3c   : > { %s3166_s10 = scalar_select %p2801_p13, 1, 0 }
  0x3d   : > { %p2435_p1 = pnand %p2801_p13, %p2433_p8  ;;  %p2438_p4 = scmp.lt.u32.totalorder %s2782_s13, %s3163_s1 }
  0x3e   : > { %p2439_p5 = scmp.lt.u32.totalorder %s2437_s12, %s2432_s18  ;;  %p2441_p9 = scmp.lt.u32.totalorder %s2432_s18, %s2782_s13 }
  0x3f   : > { %p2436_p2 = pneg %p2435_p1 }
  0x40   : > { %p2440_p7 = por %p2439_p5, %p2438_p4 }
  0x42   : > { %p2442_p10 = por %p2441_p9, %p2440_p7 }
  0x44   : > { %p2443_p3 = pnand %p2442_p10, %p2436_p2 }
  0x46   : > { %2446 = shalt.err (!%p2443_p3)
}
  0x47   : > { %s2447_s15 = scalar_lea.vmem %s2786_s14, 16384  ;;  %s2645_s9 = smov [#allocation6]  }
  0x48   : > { %p2448_p6 = scmp.ne.s32.totalorder %s2786_s14, %s2447_s15  ;;  %s2452_s11 = sshll.u32 %s2645_s9, 4  ;;  %s2453_s11 = int_to_ptr.vmem [resolvable:$false] %s2452_s11 }
  0x49   : > { %s2454_s25 = scalar_lea.vmem %s2453_s11, 32768  ;;  %p2455_p0 = scmp.lt.s32.totalorder %s2786_s14, %s2453_s11 }
  0x4a   : > { %p2450_p8 = pnand %p2448_p6, %p2801_p13  ;;  %p2456_p11 = scmp.lt.s32.totalorder %s2454_s25, %s2447_s15 }
  0x4c   : > { %p2451_p1 = pneg %p2450_p8  ;;  %p2457_p4 = por %p2456_p11, %p2455_p0 }
  0x4e   : > { %p2458_p5 = pnand %p2457_p4, %p2451_p1 }
  0x50   : > { %2461 = shalt.err (!%p2458_p5)
}
  0x51   : > { %s2646_s18 = smov 2048   ;;  %s2647_s12 = smov 256  }
  0x52   : > { %s2648_s29 = smov 16   ;;  %s2649_s30 = smov [#allocation3]  }
  0x53   : > { %2105 = dma.hbm_to_vmem [thread:$0]  (!%p3165_p12), %s2782_s13, 16384, %s2786_s14, %s2795_s17, %s2646_s18, %s2647_s12, %s2648_s29  }
  0x54   : > { %s207_s9 = sshll.u32 %s2649_s30, 4  ;;  %s1838_s1 = sshll.u32 %s2773_s8, 2  ;;  %s208_s9 = int_to_ptr.vmem [resolvable:$true] %s207_s9 }
  0x55   : > { %s2462_s25 = scalar_lea.hbm %s3135_s0, 512  ;;  %p3167_p0 = scmp.ne.s32.totalorder %s3159_s6, 0 }
  0x56   : > { %p2463_p11 = scmp.ne.s32.totalorder %s3135_s0, %s2462_s25  ;;  %p2469_p10 = scmp.lt.u32.totalorder %s2462_s25, %s3135_s0 }
  0x57   : > { %p3168_p2 = pneg %p3167_p0 }
  0x59   : > { %p2465_p7 = pnand %p2463_p11, %p3168_p2 }
  0x5b   : > { %p2466_p9 = pneg %p2465_p7 }
  0x5d   : > { %p2471_p3 = pnand %p2469_p10, %p2466_p9 }
  0x5f   : > { %2474 = shalt.err (!%p2471_p3)
}
  0x60   : > { %s2475_s30 = scalar_lea.vmem %s208_s9, 512  ;;  %p3169_p8 = pmov %p3168_p2 }
  0x61   : > { %p2476_p6 = scmp.ne.s32.totalorder %s208_s9, %s2475_s30  ;;  %p2483_p5 = scmp.lt.s32.totalorder %s208_s9, %s208_s9 }
  0x62   : > { %p2484_p12 = scmp.lt.s32.totalorder %s2475_s30, %s2475_s30 }
  0x63   : > { %p2478_p1 = pnand %p2476_p6, %p3169_p8 }
  0x64   : > { %p2485_p13 = por %p2484_p12, %p2483_p5 }
  0x65   : > { %p2479_p4 = pneg %p2478_p1 }
  0x67   : > { %p2486_p2 = pnand %p2485_p13, %p2479_p4 }
  0x69   : > { %2489 = shalt.err (!%p2486_p2)
}
  0x6a   : > { %2098 = dma.hbm_to_vmem [thread:$0]  (!%p3167_p0), %s3135_s0, 512, %s208_s9, [#allocation4]  }
  0x6b   : > { %s2019_s20 = sshll.u32 %s2638_s22, 6  ;;  %s254_s18 = scalar_lea.vmem [#allocation8], %s1838_s1 }
  0x6c   : > { %s2850_s16 = scalar_lea.hbm %s3137_s2, %s2019_s20  ;;  %s262_s12 = sshll.u32 %s254_s18, 4  ;;  %s263_s12 = int_to_ptr.vmem [resolvable:$true] %s262_s12 }
  0x6d   : > { %s2490_s6 = scalar_lea.hbm %s2850_s16, 64  ;;  %p3170_p13 = scmp.ne.s32.totalorder %s3166_s10, 0 }
  0x6e   : > { %p2491_p12 = scmp.ne.s32.totalorder %s2850_s16, %s2490_s6  ;;  %s2495_s11 = scalar_lea.hbm %s3137_s2, 512 }
  0x6f   : > { %p2496_p0 = scmp.lt.u32.totalorder %s2850_s16, %s3137_s2  ;;  %p2497_p9 = scmp.lt.u32.totalorder %s2495_s11, %s2490_s6 }
  0x70   : > { %p2493_p11 = pnand %p2491_p12, %p3170_p13  ;;  %p2499_p3 = scmp.lt.u32.totalorder %s2490_s6, %s2850_s16 }
  0x71   : > { %p2498_p10 = por %p2497_p9, %p2496_p0 }
  0x72   : > { %p2494_p7 = pneg %p2493_p11 }
  0x73   : > { %p2500_p6 = por %p2499_p3, %p2498_p10 }
  0x75   : > { %p2501_p8 = pnand %p2500_p6, %p2494_p7 }
  0x77   : > { %2504 = shalt.err (!%p2501_p8)
}
  0x78   : > { %s2505_s1 = scalar_lea.vmem %s263_s12, 64  ;;  %s2650_s30 = smov [#allocation8]  }
  0x79   : > { %p2506_p1 = scmp.ne.s32.totalorder %s263_s12, %s2505_s1  ;;  %s2510_s4 = sshll.u32 %s2650_s30, 4  ;;  %s2511_s4 = int_to_ptr.vmem [resolvable:$false] %s2510_s4 }
  0x7a   : > { %s2512_s28 = scalar_lea.vmem %s2511_s4, 128  ;;  %p2513_p2 = scmp.lt.s32.totalorder %s263_s12, %s2511_s4 }
  0x7b   : > { %p2508_p4 = pnand %p2506_p1, %p3170_p13  ;;  %p2514_p12 = scmp.lt.s32.totalorder %s2512_s28, %s2505_s1 }
  0x7d   : > { %p2509_p5 = pneg %p2508_p4  ;;  %p2515_p11 = por %p2514_p12, %p2513_p2 }
  0x7f   : > { %p2516_p0 = pnand %p2515_p11, %p2509_p5 }
  0x81   : > { %2519 = shalt.err (!%p2516_p0)
}
  0x82   : > { %p3171_p9 = scmp.ne.s32.totalorder %s3160_s7, 0  ;;  %s1841_s20 = sshll.u32 %s2773_s8, 8 }
  0x83   : > { %s2020_s13 = sshll.u32 %s2638_s22, 12  ;;  %s273_s29 = scalar_lea.vmem [#allocation9], %s1841_s20 }
  0x84   : > { %2108 = dma.hbm_to_vmem [thread:$0]  (!%p3171_p9), %s2850_s16, 64, %s263_s12, %s2795_s17  }
  0x85   : > { %s2875_s6 = scalar_lea.hbm %s3138_s3, %s2020_s13  ;;  %s280_s9 = sshll.u32 %s273_s29, 4  ;;  %s2877_s9 = int_to_ptr.vmem [resolvable:$true] %s280_s9 }
  0x86   : > { %s3172_s11 = sand.u32 1, %s2642_s23   ;;  %s2520_s25 = scalar_lea.hbm %s2875_s6, 4096 }
  0x87   : > { %s2881_s15 = scalar_lea.sflag [#allocation10], %s3172_s11  ;;  %p2521_p7 = scmp.ne.s32.totalorder %s2875_s6, %s2520_s25 }
  0x88   : > { %s2525_s16 = scalar_lea.hbm %s3138_s3, 32768  ;;  %p2526_p6 = scmp.lt.u32.totalorder %s2875_s6, %s3138_s3 }
  0x89   : > { %p2523_p10 = pnand %p2521_p7, %p3170_p13  ;;  %p2527_p8 = scmp.lt.u32.totalorder %s2525_s16, %s2520_s25 }
  0x8a   : > { %p2529_p4 = scmp.lt.u32.totalorder %s2520_s25, %s2875_s6 }
  0x8b   : > { %p2524_p3 = pneg %p2523_p10  ;;  %p2528_p1 = por %p2527_p8, %p2526_p6 }
  0x8d   : > { %p2530_p5 = por %p2529_p4, %p2528_p1 }
  0x8f   : > { %p2531_p2 = pnand %p2530_p5, %p2524_p3 }
  0x91   : > { %2534 = shalt.err (!%p2531_p2)
}
  0x92   : > { %s2535_s30 = scalar_lea.vmem %s2877_s9, 4096  ;;  %s2651_s4 = smov [#allocation9]  }
  0x93   : > { %p2536_p12 = scmp.ne.s32.totalorder %s2877_s9, %s2535_s30  ;;  %s2540_s28 = sshll.u32 %s2651_s4, 4  ;;  %s2541_s28 = int_to_ptr.vmem [resolvable:$false] %s2540_s28 }
  0x94   : > { %s2542_s20 = scalar_lea.vmem %s2541_s28, 8192  ;;  %p2543_p7 = scmp.lt.s32.totalorder %s2877_s9, %s2541_s28 }
  0x95   : > { %p2538_p11 = pnand %p2536_p12, %p3170_p13  ;;  %p2544_p10 = scmp.lt.s32.totalorder %s2542_s20, %s2535_s30 }
  0x97   : > { %p2539_p0 = pneg %p2538_p11  ;;  %p2545_p6 = por %p2544_p10, %p2543_p7 }
  0x99   : > { %p2546_p8 = pnand %p2545_p6, %p2539_p0 }
  0x9b   : > { %2549 = shalt.err (!%p2546_p8)
}
  0x9c   : > { %s2652_s13 = smov 64   ;;  %s2653_s14 = smov 4  }
  0x9d   : > { %2111 = dma.hbm_to_vmem [thread:$0]  (!%p3171_p9), %s2875_s6, 4096, %s2877_s9, %s2881_s15, %s2652_s13, %s2652_s13, %s2653_s14  }
  0x9e   : > { %p3173_p13 = scmp.ne.s32.totalorder %s3158_s27, 0 }
  0x9f   : > { %p3174_p3 = scmp.eq.s32.totalorder (!%p3173_p13), %s2715_s24, 0 }
  0xa0   : > { %292 = sbr.rel (%p3173_p13) target bundleno = 819 (0x333), region = 40 }
  0xa7   : > { %2601 = dma.done.wait (%p3174_p3), [#allocation4], 512   ;;  %p3175_p1 = pmov %p3174_p3 }
  0xa8   : > { %s298_s10 = sand.u32 1, %s2715_s24   ;;  %s300_s18 = sand.u32 1, %s2626_s19  }
  0xa9   : > { %2603 = vsyncadd (%p3175_p1), [#allocation4], 4294966784  ;;  %s1846_s29 = sshll.u32 %s300_s18, 10  ;;  %s299_s11 = scalar_lea.sflag [#allocation7], %s298_s10 }
  0xaa   : > { %s2913_s25 = scalar_lea.vmem [#allocation6], %s1846_s29  ;;  %p3176_p4 = scmp.ne.s32.totalorder %s3157_s26, 0 }
  0xac   : > { %2605 = dma.done.wait (%p3176_p4), %s299_s11, 16448  }
  0xad   : > { %2607 = vsyncadd (%p3176_p4), %s299_s11, 4294950848  ;;  %s1847_s27 = sshll.u32 %s300_s18, 2  ;;  %s1848_s7 = sshll.u32 %s300_s18, 8 }
  0xae   : > { %s2919_s6 = scalar_lea.vmem [#allocation8], %s1847_s27  ;;  %s317_s9 = scalar_lea.sflag [#allocation10], %s298_s10 }
  0xaf   : > { %s2921_s15 = scalar_lea.vmem [#allocation9], %s1848_s7 }
  0xb0   : > { %2609 = dma.done.wait (%p3176_p4), %s317_s9, 4096  }
  0xb1   : > { %2611 = vsyncadd (%p3176_p4), %s317_s9, 4294963200  ;;  %p3177_p9 = pmov %p3175_p1 }
  0xb2   : > { %p3178_p5 = pmov %p3175_p1 }
  0xb3   : > { %2613 = dma.done.wait (%p3177_p9), [#allocation10], 16  }
  0xb4   : > { %2615 = vsyncadd (%p3178_p5), [#allocation10], 4294967280  ;;  %p1850_p2 = scmp.ne.s32.totalorder %s2634_s21, 0 }
  0xb5   : > { %v2654_v0 = vmov (!%p1850_p2), 0.0  }
  0xb6   : > { %363 = sbr.rel (%p1850_p2) target bundleno = 189 (0xbd), region = 64  ;;  %364 = vst [vmem:[#allocation2] sm:$0xff] (!%p1850_p2), %v2654_v0 }
  0xbd PF: > { %v2176_v1 = vld [vmem:[%s2913_s25 + $0x4] ss:$16 sps:$4 sm:$0xff]   ;;  %v2178_v2 = vld [vmem:[%s2913_s25 + $0xc] ss:$16 sps:$4 sm:$0xff]   ;;  %v2180_v3 = vld [vmem:[%s2913_s25] ss:$16 sps:$4 sm:$0xff]  }
  0xbe   : > { %1163 = vmatprep.subr.bf16.mxu0 %v2176_v1  ;;  %v2181_v4 = vld [vmem:[%s2913_s25 + $0x8] ss:$16 sps:$4 sm:$0xff]   ;;  %1245 = vmatprep.subr.bf16.mxu1 %v2178_v2  ;;  %v2182_v5 = vld [vmem:[%s2913_s25 + $0x24] ss:$16 sps:$4 sm:$0xff]   ;;  %v2184_v6 = vld [vmem:[%s2913_s25 + $0x2c] ss:$16 sps:$4 sm:$0xff]  }
  0xbf   : > { %1164 = vmatpush1.bf16.msra.mxu0 %v2180_v3  ;;  %1246 = vmatpush1.bf16.msra.mxu1 %v2181_v4  ;;  %v2186_v7 = vld [vmem:[%s2913_s25 + $0x20] ss:$16 sps:$4 sm:$0xff]   ;;  %v2187_v8 = vld [vmem:[%s2913_s25 + $0x28] ss:$16 sps:$4 sm:$0xff]   ;;  %v2188_v9 = vld [vmem:[%s2913_s25 + $0x44] ss:$16 sps:$4 sm:$0xff]  }
  0xc0   : > { %1165 = vmatprep.subr.bf16.mxu0 %v2182_v5  ;;  %1247 = vmatprep.subr.bf16.mxu1 %v2184_v6  ;;  %v2190_v10 = vld [vmem:[%s2913_s25 + $0x4c] ss:$16 sps:$4 sm:$0xff]   ;;  %v2192_v11 = vld [vmem:[%s2913_s25 + $0x40] ss:$16 sps:$4 sm:$0xff]   ;;  %v2193_v12 = vld [vmem:[%s2913_s25 + $0x48] ss:$16 sps:$4 sm:$0xff]  }
  0xc1   : > { %v2194_v13 = vld [vmem:[%s2913_s25 + $0x64] ss:$16 sps:$4 sm:$0xff]   ;;  %v2196_v14 = vld [vmem:[%s2913_s25 + $0x6c] ss:$16 sps:$4 sm:$0xff]   ;;  %v2198_v15 = vld [vmem:[%s2913_s25 + $0x60] ss:$16 sps:$4 sm:$0xff]  }
  0xc2   : > { %v2199_v16 = vld [vmem:[%s2913_s25 + $0x68] ss:$16 sps:$4 sm:$0xff]   ;;  %v2200_v17 = vld [vmem:[%s2913_s25 + $0x84] ss:$16 sps:$4 sm:$0xff]   ;;  %v2202_v18 = vld [vmem:[%s2913_s25 + $0x8c] ss:$16 sps:$4 sm:$0xff]  }
  0xc3   : > { %1166 = vmatpush1.bf16.msra.mxu0 %v2186_v7  ;;  %1248 = vmatpush1.bf16.msra.mxu1 %v2187_v8  ;;  %v2204_v19 = vld [vmem:[%s2913_s25 + $0x80] ss:$16 sps:$4 sm:$0xff]   ;;  %v2205_v20 = vld [vmem:[%s2913_s25 + $0x88] ss:$16 sps:$4 sm:$0xff]   ;;  %v2206_v21 = vld [vmem:[%s2913_s25 + $0xa4] ss:$16 sps:$4 sm:$0xff]  }
  0xc4   : > { %1167 = vmatprep.subr.bf16.mxu0 %v2188_v9  ;;  %1249 = vmatprep.subr.bf16.mxu1 %v2190_v10  ;;  %v2208_v22 = vld [vmem:[%s2913_s25 + $0xac] ss:$16 sps:$4 sm:$0xff]   ;;  %v2210_v23 = vld [vmem:[%s2913_s25 + $0xa0] ss:$16 sps:$4 sm:$0xff]   ;;  %v2211_v24 = vld [vmem:[%s2913_s25 + $0xa8] ss:$16 sps:$4 sm:$0xff]  }
  0xc5   : > { %v2212_v25 = vld [vmem:[%s2913_s25 + $0xc4] ss:$16 sps:$4 sm:$0xff]   ;;  %v2214_v26 = vld [vmem:[%s2913_s25 + $0xcc] ss:$16 sps:$4 sm:$0xff]   ;;  %v2216_v27 = vld [vmem:[%s2913_s25 + $0xc0] ss:$16 sps:$4 sm:$0xff]  }
  0xc6   : > { %v2217_v28 = vld [vmem:[%s2913_s25 + $0xc8] ss:$16 sps:$4 sm:$0xff]   ;;  %v2218_v29 = vld [vmem:[%s2913_s25 + $0xe4] ss:$16 sps:$4 sm:$0xff]   ;;  %v2220_v30 = vld [vmem:[%s2913_s25 + $0xec] ss:$16 sps:$4 sm:$0xff]  }
  0xc7   : > { %1168 = vmatpush1.bf16.msra.mxu0 %v2192_v11  ;;  %1250 = vmatpush1.bf16.msra.mxu1 %v2193_v12  ;;  %v2222_v31 = vld [vmem:[%s2913_s25 + $0xe0] ss:$16 sps:$4 sm:$0xff]   ;;  %v2223_v32 = vld [vmem:[%s2913_s25 + $0xe8] ss:$16 sps:$4 sm:$0xff]   ;;  %v2224_v33 = vld [vmem:[%s2913_s25 + $0x104] ss:$16 sps:$4 sm:$0xff]  }
  0xc8   : > { %1169 = vmatprep.subr.bf16.mxu0 %v2194_v13  ;;  %1251 = vmatprep.subr.bf16.mxu1 %v2196_v14  ;;  %v2226_v34 = vld [vmem:[%s2913_s25 + $0x10c] ss:$16 sps:$4 sm:$0xff]   ;;  %v2228_v35 = vld [vmem:[%s2913_s25 + $0x100] ss:$16 sps:$4 sm:$0xff]   ;;  %v2229_v36 = vld [vmem:[%s2913_s25 + $0x108] ss:$16 sps:$4 sm:$0xff]  }
  0xc9   : > { %v2230_v37 = vld [vmem:[%s2913_s25 + $0x124] ss:$16 sps:$4 sm:$0xff]   ;;  %v2232_v38 = vld [vmem:[%s2913_s25 + $0x12c] ss:$16 sps:$4 sm:$0xff]   ;;  %v2234_v39 = vld [vmem:[%s2913_s25 + $0x120] ss:$16 sps:$4 sm:$0xff]  }
  0xca   : > { %v2235_v40 = vld [vmem:[%s2913_s25 + $0x128] ss:$16 sps:$4 sm:$0xff]   ;;  %v2236_v41 = vld [vmem:[%s2913_s25 + $0x144] ss:$16 sps:$4 sm:$0xff]   ;;  %v2238_v42 = vld [vmem:[%s2913_s25 + $0x14c] ss:$16 sps:$4 sm:$0xff]  }
  0xcb   : > { %1170 = vmatpush1.bf16.msra.mxu0 %v2198_v15  ;;  %1252 = vmatpush1.bf16.msra.mxu1 %v2199_v16  ;;  %v2240_v43 = vld [vmem:[%s2913_s25 + $0x140] ss:$16 sps:$4 sm:$0xff]   ;;  %v2241_v44 = vld [vmem:[%s2913_s25 + $0x148] ss:$16 sps:$4 sm:$0xff]   ;;  %v2242_v45 = vld [vmem:[%s2913_s25 + $0x164] ss:$16 sps:$4 sm:$0xff]  }
  0xcc   : > { %1171 = vmatprep.subr.bf16.mxu0 %v2200_v17  ;;  %1253 = vmatprep.subr.bf16.mxu1 %v2202_v18  ;;  %v2244_v46 = vld [vmem:[%s2913_s25 + $0x16c] ss:$16 sps:$4 sm:$0xff]   ;;  %v2246_v48 = vld [vmem:[%s2913_s25 + $0x160] ss:$16 sps:$4 sm:$0xff]   ;;  %v2247_v50 = vld [vmem:[%s2913_s25 + $0x168] ss:$16 sps:$4 sm:$0xff]  }
  0xcd   : > { %v366_v47 = vld [vmem:[#allocation3 + $0x8] sm:$0xff]  ;;  %v2248_v51 = vld [vmem:[%s2913_s25 + $0x184] ss:$16 sps:$4 sm:$0xff]   ;;  %v2252_v53 = vld [vmem:[%s2913_s25 + $0x180] ss:$16 sps:$4 sm:$0xff]   ;;  %p2011_p12 = scmp.ne.s32.totalorder %s2634_s21, 7 }
  0xce   : > { %v370_v49 = vpack.c.bf16 %v366_v47, %v366_v47  ;;  %v2250_v52 = vld [vmem:[%s2913_s25 + $0x18c] ss:$16 sps:$4 sm:$0xff]   ;;  %v2253_v54 = vld [vmem:[%s2913_s25 + $0x188] ss:$16 sps:$4 sm:$0xff]   ;;  %v2254_v55 = vld [vmem:[%s2913_s25 + $0x1a4] ss:$16 sps:$4 sm:$0xff]  }
  0xcf   : > { %1172 = vmatpush1.bf16.msra.mxu0 %v2204_v19  ;;  %1254 = vmatpush1.bf16.msra.mxu1 %v2205_v20  ;;  %v2256_v56 = vld [vmem:[%s2913_s25 + $0x1ac] ss:$16 sps:$4 sm:$0xff]   ;;  %v2258_v57 = vld [vmem:[%s2913_s25 + $0x1a0] ss:$16 sps:$4 sm:$0xff]   ;;  %v2259_v58 = vld [vmem:[%s2913_s25 + $0x1a8] ss:$16 sps:$4 sm:$0xff]  }
  0xd0   : > { %1173 = vmatprep.subr.bf16.mxu0 %v2206_v21  ;;  %1255 = vmatprep.subr.bf16.mxu1 %v2208_v22  ;;  %v2260_v59 = vld [vmem:[%s2913_s25 + $0x1c4] ss:$16 sps:$4 sm:$0xff]   ;;  %v2262_v60 = vld [vmem:[%s2913_s25 + $0x1cc] ss:$16 sps:$4 sm:$0xff]   ;;  %v2264_v61 = vld [vmem:[%s2913_s25 + $0x1c0] ss:$16 sps:$4 sm:$0xff]  }
  0xd1   : > { %1195 = vmatprep.mubr.bf16.mxu0 %v370_v49  ;;  %1277 = vmatprep.mubr.bf16.mxu1 %v370_v49  ;;  %v2265_v62 = vld [vmem:[%s2913_s25 + $0x1c8] ss:$16 sps:$4 sm:$0xff]   ;;  %v2266_v63 = vld [vmem:[%s2913_s25 + $0x1e4] ss:$16 sps:$4 sm:$0xff]   ;;  %v2268_v0 = vld [vmem:[%s2913_s25 + $0x1ec] ss:$16 sps:$4 sm:$0xff]  }
  0xd2   : > { %v2270_v1 = vld [vmem:[%s2913_s25 + $0x1e0] ss:$16 sps:$4 sm:$0xff]   ;;  %v2271_v2 = vld [vmem:[%s2913_s25 + $0x1e8] ss:$16 sps:$4 sm:$0xff]   ;;  %v2274_v4 = vld [vmem:[%s2913_s25 + $0x204] ss:$16 sps:$4 sm:$0xff]  }
  0xd3   : > { %1174 = vmatpush1.bf16.msra.mxu0 %v2210_v23  ;;  %1256 = vmatpush1.bf16.msra.mxu1 %v2211_v24  ;;  %v365_v3 = vld [vmem:[#allocation3] sm:$0xff]  ;;  %v2277_v5 = vld [vmem:[%s2913_s25 + $0x20c] ss:$16 sps:$4 sm:$0xff]   ;;  %v2275_v8 = vld [vmem:[%s2913_s25 + $0x208] ss:$16 sps:$4 sm:$0xff]  }
  0xd4   : > { %1175 = vmatprep.subr.bf16.mxu0 %v2212_v25  ;;  %1257 = vmatprep.subr.bf16.mxu1 %v2214_v26  ;;  %v369_v6 = vpack.c.bf16 %v365_v3, %v365_v3  ;;  %v2272_v7 = vld [vmem:[%s2913_s25 + $0x200] ss:$16 sps:$4 sm:$0xff]   ;;  %v2280_v9 = vld [vmem:[%s2913_s25 + $0x224] ss:$16 sps:$4 sm:$0xff]   ;;  %v2283_v10 = vld [vmem:[%s2913_s25 + $0x22c] ss:$16 sps:$4 sm:$0xff]  }
  0xd5   : > { %v2278_v11 = vld [vmem:[%s2913_s25 + $0x220] ss:$16 sps:$4 sm:$0xff]   ;;  %v2281_v12 = vld [vmem:[%s2913_s25 + $0x228] ss:$16 sps:$4 sm:$0xff]   ;;  %v2286_v13 = vld [vmem:[%s2913_s25 + $0x244] ss:$16 sps:$4 sm:$0xff]  }
  0xd6   : > { %v2289_v14 = vld [vmem:[%s2913_s25 + $0x24c] ss:$16 sps:$4 sm:$0xff]   ;;  %v2284_v15 = vld [vmem:[%s2913_s25 + $0x240] ss:$16 sps:$4 sm:$0xff]   ;;  %v2287_v16 = vld [vmem:[%s2913_s25 + $0x248] ss:$16 sps:$4 sm:$0xff]  }
  0xd7   : > { %1176 = vmatpush1.bf16.msra.mxu0 %v2216_v27  ;;  %1258 = vmatpush1.bf16.msra.mxu1 %v2217_v28  ;;  %v2292_v17 = vld [vmem:[%s2913_s25 + $0x264] ss:$16 sps:$4 sm:$0xff]   ;;  %v2295_v18 = vld [vmem:[%s2913_s25 + $0x26c] ss:$16 sps:$4 sm:$0xff]   ;;  %v2290_v19 = vld [vmem:[%s2913_s25 + $0x260] ss:$16 sps:$4 sm:$0xff]  }
  0xd8   : > { %1177 = vmatprep.subr.bf16.mxu0 %v2218_v29  ;;  %1259 = vmatprep.subr.bf16.mxu1 %v2220_v30  ;;  %v2293_v20 = vld [vmem:[%s2913_s25 + $0x268] ss:$16 sps:$4 sm:$0xff]   ;;  %v2298_v21 = vld [vmem:[%s2913_s25 + $0x284] ss:$16 sps:$4 sm:$0xff]   ;;  %v2301_v22 = vld [vmem:[%s2913_s25 + $0x28c] ss:$16 sps:$4 sm:$0xff]  }
  0xd9   : > { %v2296_v23 = vld [vmem:[%s2913_s25 + $0x280] ss:$16 sps:$4 sm:$0xff]   ;;  %v2299_v24 = vld [vmem:[%s2913_s25 + $0x288] ss:$16 sps:$4 sm:$0xff]   ;;  %v2304_v25 = vld [vmem:[%s2913_s25 + $0x2a4] ss:$16 sps:$4 sm:$0xff]  }
  0xda   : > { %v2307_v26 = vld [vmem:[%s2913_s25 + $0x2ac] ss:$16 sps:$4 sm:$0xff]   ;;  %v2302_v27 = vld [vmem:[%s2913_s25 + $0x2a0] ss:$16 sps:$4 sm:$0xff]   ;;  %v2305_v28 = vld [vmem:[%s2913_s25 + $0x2a8] ss:$16 sps:$4 sm:$0xff]  }
  0xdb   : > { %1178 = vmatpush1.bf16.msra.mxu0 %v2222_v31  ;;  %1260 = vmatpush1.bf16.msra.mxu1 %v2223_v32  ;;  %v2310_v29 = vld [vmem:[%s2913_s25 + $0x2c4] ss:$16 sps:$4 sm:$0xff]   ;;  %v2313_v30 = vld [vmem:[%s2913_s25 + $0x2cc] ss:$16 sps:$4 sm:$0xff]   ;;  %v2308_v31 = vld [vmem:[%s2913_s25 + $0x2c0] ss:$16 sps:$4 sm:$0xff]  }
  0xdc   : > { %1179 = vmatprep.subr.bf16.mxu0 %v2224_v33  ;;  %1261 = vmatprep.subr.bf16.mxu1 %v2226_v34  ;;  %v368_v32 = vld [vmem:[#allocation3 + $0x18] sm:$0xff]  ;;  %v2334_v47 = vld [vmem:[%s2913_s25 + $0x344] ss:$16 sps:$4 sm:$0xff]   ;;  %v2332_v49 = vld [vmem:[%s2913_s25 + $0x340] ss:$16 sps:$4 sm:$0xff]  }
  0xdd   : > { %v2311_v33 = vld [vmem:[%s2913_s25 + $0x2c8] ss:$16 sps:$4 sm:$0xff]   ;;  %v372_v34 = vpack.c.bf16 %v368_v32, %v368_v32  ;;  %v2364_v3 = vld [vmem:[%s2913_s25 + $0x3e4] ss:$16 sps:$4 sm:$0xff]  }
  0xde   : > { %v2391_v32 = vld [vmem:[%s2921_s15 + $0xa8] sm:$0xff]  }
  0xdf   : > { %1180 = vmatpush1.bf16.msra.mxu0 %v2228_v35  ;;  %1262 = vmatpush1.bf16.msra.mxu1 %v2229_v36  ;;  %v2316_v35 = vld [vmem:[%s2913_s25 + $0x2e4] ss:$16 sps:$4 sm:$0xff]   ;;  %v2319_v36 = vld [vmem:[%s2913_s25 + $0x2ec] ss:$16 sps:$4 sm:$0xff]  }
  0xe0   : > { %1181 = vmatprep.subr.bf16.mxu0 %v2230_v37  ;;  %1263 = vmatprep.subr.bf16.mxu1 %v2232_v38  ;;  %v2314_v37 = vld [vmem:[%s2913_s25 + $0x2e0] ss:$16 sps:$4 sm:$0xff]   ;;  %v2317_v38 = vld [vmem:[%s2913_s25 + $0x2e8] ss:$16 sps:$4 sm:$0xff]  }
  0xe3   : > { %1182 = vmatpush1.bf16.msra.mxu0 %v2234_v39  ;;  %1264 = vmatpush1.bf16.msra.mxu1 %v2235_v40  ;;  %v2322_v39 = vld [vmem:[%s2913_s25 + $0x304] ss:$16 sps:$4 sm:$0xff]   ;;  %v2325_v40 = vld [vmem:[%s2913_s25 + $0x30c] ss:$16 sps:$4 sm:$0xff]  }
  0xe4   : > { %1183 = vmatprep.subr.bf16.mxu0 %v2236_v41  ;;  %1265 = vmatprep.subr.bf16.mxu1 %v2238_v42  ;;  %v2320_v41 = vld [vmem:[%s2913_s25 + $0x300] ss:$16 sps:$4 sm:$0xff]   ;;  %v2323_v42 = vld [vmem:[%s2913_s25 + $0x308] ss:$16 sps:$4 sm:$0xff]  }
  0xe7   : > { %1184 = vmatpush1.bf16.msra.mxu0 %v2240_v43  ;;  %1266 = vmatpush1.bf16.msra.mxu1 %v2241_v44  ;;  %v2328_v43 = vld [vmem:[%s2913_s25 + $0x324] ss:$16 sps:$4 sm:$0xff]   ;;  %v2331_v44 = vld [vmem:[%s2913_s25 + $0x32c] ss:$16 sps:$4 sm:$0xff]  }
  0xe8   : > { %1185 = vmatprep.subr.bf16.mxu0 %v2242_v45  ;;  %1267 = vmatprep.subr.bf16.mxu1 %v2244_v46  ;;  %v2326_v45 = vld [vmem:[%s2913_s25 + $0x320] ss:$16 sps:$4 sm:$0xff]   ;;  %v2329_v46 = vld [vmem:[%s2913_s25 + $0x328] ss:$16 sps:$4 sm:$0xff]  }
  0xeb   : > { %1186 = vmatpush1.bf16.msra.mxu0 %v2246_v48  ;;  %1268 = vmatpush1.bf16.msra.mxu1 %v2247_v50  ;;  %v2337_v48 = vld [vmem:[%s2913_s25 + $0x34c] ss:$16 sps:$4 sm:$0xff]   ;;  %v2335_v50 = vld [vmem:[%s2913_s25 + $0x348] ss:$16 sps:$4 sm:$0xff]  }
  0xec   : > { %1187 = vmatprep.subr.bf16.mxu0 %v2248_v51  ;;  %1269 = vmatprep.subr.bf16.mxu1 %v2250_v52  ;;  %v2340_v51 = vld [vmem:[%s2913_s25 + $0x364] ss:$16 sps:$4 sm:$0xff]   ;;  %v2343_v52 = vld [vmem:[%s2913_s25 + $0x36c] ss:$16 sps:$4 sm:$0xff]  }
  0xef   : > { %1188 = vmatpush1.bf16.msra.mxu0 %v2252_v53  ;;  %1270 = vmatpush1.bf16.msra.mxu1 %v2253_v54  ;;  %v2338_v53 = vld [vmem:[%s2913_s25 + $0x360] ss:$16 sps:$4 sm:$0xff]   ;;  %v2341_v54 = vld [vmem:[%s2913_s25 + $0x368] ss:$16 sps:$4 sm:$0xff]  }
  0xf0   : > { %1189 = vmatprep.subr.bf16.mxu0 %v2254_v55  ;;  %1271 = vmatprep.subr.bf16.mxu1 %v2256_v56  ;;  %v2346_v55 = vld [vmem:[%s2913_s25 + $0x384] ss:$16 sps:$4 sm:$0xff]   ;;  %v2349_v56 = vld [vmem:[%s2913_s25 + $0x38c] ss:$16 sps:$4 sm:$0xff]  }
  0xf3   : > { %1190 = vmatpush1.bf16.msra.mxu0 %v2258_v57  ;;  %1272 = vmatpush1.bf16.msra.mxu1 %v2259_v58  ;;  %v2344_v57 = vld [vmem:[%s2913_s25 + $0x380] ss:$16 sps:$4 sm:$0xff]   ;;  %v2347_v58 = vld [vmem:[%s2913_s25 + $0x388] ss:$16 sps:$4 sm:$0xff]  }
  0xf4   : > { %1191 = vmatprep.subr.bf16.mxu0 %v2260_v59  ;;  %1273 = vmatprep.subr.bf16.mxu1 %v2262_v60  ;;  %v2352_v59 = vld [vmem:[%s2913_s25 + $0x3a4] ss:$16 sps:$4 sm:$0xff]   ;;  %v2355_v60 = vld [vmem:[%s2913_s25 + $0x3ac] ss:$16 sps:$4 sm:$0xff]  }
  0xf7   : > { %1192 = vmatpush1.bf16.msra.mxu0 %v2264_v61  ;;  %1274 = vmatpush1.bf16.msra.mxu1 %v2265_v62  ;;  %v2350_v61 = vld [vmem:[%s2913_s25 + $0x3a0] ss:$16 sps:$4 sm:$0xff]   ;;  %v2353_v62 = vld [vmem:[%s2913_s25 + $0x3a8] ss:$16 sps:$4 sm:$0xff]  }
  0xf8   : > { %1193 = vmatprep.subr.bf16.mxu0 %v2266_v63  ;;  %1275 = vmatprep.subr.bf16.mxu1 %v2268_v0  ;;  %v2358_v63 = vld [vmem:[%s2913_s25 + $0x3c4] ss:$16 sps:$4 sm:$0xff]   ;;  %v2361_v0 = vld [vmem:[%s2913_s25 + $0x3cc] ss:$16 sps:$4 sm:$0xff]  }
  0xfb   : > { %1194 = vmatpush1.bf16.msra.mxu0 %v2270_v1  ;;  %1276 = vmatpush1.bf16.msra.mxu1 %v2271_v2  ;;  %v2356_v1 = vld [vmem:[%s2913_s25 + $0x3c0] ss:$16 sps:$4 sm:$0xff]   ;;  %v2359_v2 = vld [vmem:[%s2913_s25 + $0x3c8] ss:$16 sps:$4 sm:$0xff]  }
  0xfc   : > { %1204 = vmatprep.subr.bf16.mxu0 %v2274_v4  ;;  %1286 = vmatprep.subr.bf16.mxu1 %v2277_v5  ;;  %v2367_v4 = vld [vmem:[%s2913_s25 + $0x3ec] ss:$16 sps:$4 sm:$0xff]   ;;  %v2362_v5 = vld [vmem:[%s2913_s25 + $0x3e0] ss:$16 sps:$4 sm:$0xff]  }
  0xfe   : > { %1196 = vmatmul.mubr.bf16.vlgmr.msra.gmra.mrb[0].mxu0 %v369_v6  ;;  %1278 = vmatmul.mubr.bf16.vlgmr.msra.gmra.mrb[0].mxu1 %v369_v6  ;;  %v2365_v6 = vld [vmem:[%s2913_s25 + $0x3e8] ss:$16 sps:$4 sm:$0xff]  }
  0xff   : > { %1205 = vmatpush1.bf16.msra.mxu0 %v2272_v7  ;;  %1287 = vmatpush1.bf16.msra.mxu1 %v2275_v8  ;;  %v367_v7 = vld [vmem:[#allocation3 + $0x10] sm:$0xff]  ;;  %v2368_v8 = vld [vmem:[%s2921_s15 + $0x40] sm:$0xff]  }
 0x100   : > { %1206 = vmatprep.subr.bf16.mxu0 %v2280_v9  ;;  %1288 = vmatprep.subr.bf16.mxu1 %v2283_v10  ;;  %v2369_v9 = vld [vmem:[%s2921_s15 + $0xc0] sm:$0xff]   ;;  %v371_v10 = vpack.c.bf16 %v367_v7, %v367_v7 }
 0x101   : > { %1236 = vmatprep.mubr.bf16.mxu0 %v372_v34  ;;  %1318 = vmatprep.mubr.bf16.mxu1 %v372_v34  ;;  %v2393_v34 = vld [vmem:[%s2921_s15 + $0xf0] sm:$0xff]  }
 0x103   : > { %1207 = vmatpush1.bf16.msra.mxu0 %v2278_v11  ;;  %1289 = vmatpush1.bf16.msra.mxu1 %v2281_v12  ;;  %v2370_v11 = vld [vmem:[%s2921_s15] sm:$0xff]  }
 0x104   : > { %1208 = vmatprep.subr.bf16.mxu0 %v2286_v13  ;;  %1290 = vmatprep.subr.bf16.mxu1 %v2289_v14  ;;  %v2371_v12 = vld [vmem:[%s2921_s15 + $0x80] sm:$0xff]   ;;  %v2372_v13 = vld [vmem:[%s2921_s15 + $0x48] sm:$0xff]  }
 0x105   : > { %v2373_v14 = vld [vmem:[%s2921_s15 + $0xc8] sm:$0xff]  }
 0x107   : > { %1209 = vmatpush1.bf16.msra.mxu0 %v2284_v15  ;;  %1291 = vmatpush1.bf16.msra.mxu1 %v2287_v16  ;;  %v2374_v15 = vld [vmem:[%s2921_s15 + $0x8] sm:$0xff]  }
 0x108   : > { %1210 = vmatprep.subr.bf16.mxu0 %v2292_v17  ;;  %1292 = vmatprep.subr.bf16.mxu1 %v2295_v18  ;;  %v2375_v16 = vld [vmem:[%s2921_s15 + $0x88] sm:$0xff]   ;;  %v2376_v17 = vld [vmem:[%s2921_s15 + $0x50] sm:$0xff]  }
 0x109   : > { %v2377_v18 = vld [vmem:[%s2921_s15 + $0xd0] sm:$0xff]  }
 0x10b   : > { %1211 = vmatpush1.bf16.msra.mxu0 %v2290_v19  ;;  %1293 = vmatpush1.bf16.msra.mxu1 %v2293_v20  ;;  %v2378_v19 = vld [vmem:[%s2921_s15 + $0x10] sm:$0xff]  }
 0x10c   : > { %1212 = vmatprep.subr.bf16.mxu0 %v2298_v21  ;;  %1294 = vmatprep.subr.bf16.mxu1 %v2301_v22  ;;  %v2379_v20 = vld [vmem:[%s2921_s15 + $0x90] sm:$0xff]   ;;  %v2380_v21 = vld [vmem:[%s2921_s15 + $0x58] sm:$0xff]  }
 0x10d   : > { %v2381_v22 = vld [vmem:[%s2921_s15 + $0xd8] sm:$0xff]  }
 0x10f   : > { %1213 = vmatpush1.bf16.msra.mxu0 %v2296_v23  ;;  %1295 = vmatpush1.bf16.msra.mxu1 %v2299_v24  ;;  %v2382_v23 = vld [vmem:[%s2921_s15 + $0x18] sm:$0xff]  }
 0x110   : > { %1214 = vmatprep.subr.bf16.mxu0 %v2304_v25  ;;  %1296 = vmatprep.subr.bf16.mxu1 %v2307_v26  ;;  %v2383_v24 = vld [vmem:[%s2921_s15 + $0x98] sm:$0xff]   ;;  %v2384_v25 = vld [vmem:[%s2921_s15 + $0x60] sm:$0xff]  }
 0x111   : > { %v2385_v26 = vld [vmem:[%s2921_s15 + $0xe0] sm:$0xff]  }
 0x113   : > { %1215 = vmatpush1.bf16.msra.mxu0 %v2302_v27  ;;  %1297 = vmatpush1.bf16.msra.mxu1 %v2305_v28  ;;  %v2386_v27 = vld [vmem:[%s2921_s15 + $0x20] sm:$0xff]  }
 0x114   : > { %1216 = vmatprep.subr.bf16.mxu0 %v2310_v29  ;;  %1298 = vmatprep.subr.bf16.mxu1 %v2313_v30  ;;  %v2387_v28 = vld [vmem:[%s2921_s15 + $0xa0] sm:$0xff]   ;;  %v2388_v29 = vld [vmem:[%s2921_s15 + $0x68] sm:$0xff]  }
 0x115   : > { %v2389_v30 = vld [vmem:[%s2921_s15 + $0xe8] sm:$0xff]  }
 0x117   : > { %1217 = vmatpush1.bf16.msra.mxu0 %v2308_v31  ;;  %1299 = vmatpush1.bf16.msra.mxu1 %v2311_v33  ;;  %v2390_v31 = vld [vmem:[%s2921_s15 + $0x28] sm:$0xff]   ;;  %v2392_v33 = vld [vmem:[%s2921_s15 + $0x70] sm:$0xff]  }
 0x118   : > { %1218 = vmatprep.subr.bf16.mxu0 %v2316_v35  ;;  %1300 = vmatprep.subr.bf16.mxu1 %v2319_v36  ;;  %v2394_v35 = vld [vmem:[%s2921_s15 + $0x30] sm:$0xff]  }
 0x119   : > { %v2395_v36 = vld [vmem:[%s2921_s15 + $0xb0] sm:$0xff]  }
 0x11b   : > { %1219 = vmatpush1.bf16.msra.mxu0 %v2314_v37  ;;  %1301 = vmatpush1.bf16.msra.mxu1 %v2317_v38  ;;  %v2396_v37 = vld [vmem:[%s2921_s15 + $0x78] sm:$0xff]  }
 0x11c   : > { %1220 = vmatprep.subr.bf16.mxu0 %v2322_v39  ;;  %1302 = vmatprep.subr.bf16.mxu1 %v2325_v40  ;;  %v2397_v38 = vld [vmem:[%s2921_s15 + $0xf8] sm:$0xff]  }
 0x11d   : > { %v2398_v39 = vld [vmem:[%s2921_s15 + $0x38] sm:$0xff]  }
 0x11e   : > { %v2399_v40 = vld [vmem:[%s2921_s15 + $0xb8] sm:$0xff]  }
 0x11f   : > { %1221 = vmatpush1.bf16.msra.mxu0 %v2320_v41  ;;  %1303 = vmatpush1.bf16.msra.mxu1 %v2323_v42  ;;  %v503_v41 = vlaneseq }
 0x120   : > { %1222 = vmatprep.subr.bf16.mxu0 %v2328_v43  ;;  %1304 = vmatprep.subr.bf16.mxu1 %v2331_v44 }
 0x121   : > { %v504_v42 = vshrl.u32 %v503_v41, 7 }
 0x123   : > { %1223 = vmatpush1.bf16.msra.mxu0 %v2326_v45  ;;  %1305 = vmatpush1.bf16.msra.mxu1 %v2329_v46  ;;  %v505_v43 = vsub.s32 0, %v504_v42  ;;  %v513_v44 = vsub.s32 2, %v504_v42  ;;  %v501_v45 = vld [vmem:[%s2919_s6] sm:$0xf]  ;;  %v509_v46 = vsub.s32 1, %v504_v42 }
 0x124   : > { %1224 = vmatprep.subr.bf16.mxu0 %v2334_v47  ;;  %1306 = vmatprep.subr.bf16.mxu1 %v2337_v48  ;;  %v517_v47 = vsub.s32 3, %v504_v42 }
 0x125   : > { %v506_v48 = vrot.slane %v501_v45, %v505_v43 }
 0x127   : > { %1225 = vmatpush1.bf16.msra.mxu0 %v2332_v49  ;;  %1307 = vmatpush1.bf16.msra.mxu1 %v2335_v50  ;;  %v514_v49 = vrot.slane %v501_v45, %v513_v44  ;;  %v510_v50 = vrot.slane %v501_v45, %v509_v46 }
 0x128   : > { %1226 = vmatprep.subr.bf16.mxu0 %v2340_v51  ;;  %1308 = vmatprep.subr.bf16.mxu1 %v2343_v52  ;;  %v518_v51 = vrot.slane %v501_v45, %v517_v47 }
 0x12b   : > { %1227 = vmatpush1.bf16.msra.mxu0 %v2338_v53  ;;  %1309 = vmatpush1.bf16.msra.mxu1 %v2341_v54 }
 0x12c   : > { %1228 = vmatprep.subr.bf16.mxu0 %v2346_v55  ;;  %1310 = vmatprep.subr.bf16.mxu1 %v2349_v56 }
 0x12f   : > { %1229 = vmatpush1.bf16.msra.mxu0 %v2344_v57  ;;  %1311 = vmatpush1.bf16.msra.mxu1 %v2347_v58 }
 0x130   : > { %1230 = vmatprep.subr.bf16.mxu0 %v2352_v59  ;;  %1312 = vmatprep.subr.bf16.mxu1 %v2355_v60 }
 0x133   : > { %1231 = vmatpush1.bf16.msra.mxu0 %v2350_v61  ;;  %1313 = vmatpush1.bf16.msra.mxu1 %v2353_v62 }
 0x134   : > { %1232 = vmatprep.subr.bf16.mxu0 %v2358_v63  ;;  %1314 = vmatprep.subr.bf16.mxu1 %v2361_v0 }
 0x137   : > { %1233 = vmatpush1.bf16.msra.mxu0 %v2356_v1  ;;  %1315 = vmatpush1.bf16.msra.mxu1 %v2359_v2 }
 0x138   : > { %1234 = vmatprep.subr.bf16.mxu0 %v2364_v3  ;;  %1316 = vmatprep.subr.bf16.mxu1 %v2367_v4 }
 0x13b   : > { %1235 = vmatpush1.bf16.msra.mxu0 %v2362_v5  ;;  %1317 = vmatpush1.bf16.msra.mxu1 %v2365_v6 }
 0x13c   : > { %2021 = vmatprep.subr.bf16.mxu0 %v2368_v8  ;;  %2043 = vmatprep.subr.bf16.mxu1 %v2369_v9 }
 0x13e   : > { %1237 = vmatmul.mubr.bf16.vlgmr.msra.gmra.mrb[0].mxu0 %v371_v10  ;;  %1319 = vmatmul.mubr.bf16.vlgmr.msra.gmra.mrb[0].mxu1 %v371_v10 }
 0x13f   : > { %2022 = vmatpush3.bf16.msra.mxu0 %v2370_v11  ;;  %2044 = vmatpush3.bf16.msra.mxu1 %v2371_v12 }
 0x140   : > { %2023 = vmatprep.subr.bf16.mxu0 %v2372_v13  ;;  %2045 = vmatprep.subr.bf16.mxu1 %v2373_v14 }
 0x143   : > { %2024 = vmatpush3.bf16.msra.mxu0 %v2374_v15  ;;  %2046 = vmatpush3.bf16.msra.mxu1 %v2375_v16  ;;  %v1331_v16 = vld [vmem:[#allocation2] sm:$0xff] }
 0x144   : > { %2025 = vmatprep.subr.bf16.mxu0 %v2376_v17  ;;  %2047 = vmatprep.subr.bf16.mxu1 %v2377_v18 }
 0x147   : > { %2026 = vmatpush3.bf16.msra.mxu0 %v2378_v19  ;;  %2048 = vmatpush3.bf16.msra.mxu1 %v2379_v20 }
 0x148   : > { %2027 = vmatprep.subr.bf16.mxu0 %v2380_v21  ;;  %2049 = vmatprep.subr.bf16.mxu1 %v2381_v22  ;;  %v2012_v22 = vld [vmem:[#allocation11] ss:$0 sm:$0xff] (!%p2011_p12) }
 0x14b   : > { %2028 = vmatpush3.bf16.msra.mxu0 %v2382_v23  ;;  %2050 = vmatpush3.bf16.msra.mxu1 %v2383_v24 }
 0x14c   : > { %2029 = vmatprep.subr.bf16.mxu0 %v2384_v25  ;;  %2051 = vmatprep.subr.bf16.mxu1 %v2385_v26 }
 0x14f   : > { %2030 = vmatpush3.bf16.msra.mxu0 %v2386_v27  ;;  %2052 = vmatpush3.bf16.msra.mxu1 %v2387_v28 }
 0x150   : > { %2031 = vmatprep.subr.bf16.mxu0 %v2388_v29  ;;  %2053 = vmatprep.subr.bf16.mxu1 %v2389_v30 }
 0x153   : > { %2032 = vmatpush3.bf16.msra.mxu0 %v2390_v31  ;;  %2054 = vmatpush3.bf16.msra.mxu1 %v2391_v32 }
 0x154   : > { %2033 = vmatprep.subr.bf16.mxu0 %v2392_v33  ;;  %2055 = vmatprep.subr.bf16.mxu1 %v2393_v34 }
 0x157   : > { %2034 = vmatpush3.bf16.msra.mxu0 %v2394_v35  ;;  %2056 = vmatpush3.bf16.msra.mxu1 %v2395_v36 }
 0x158   : > { %2035 = vmatprep.subr.bf16.mxu0 %v2396_v37  ;;  %2057 = vmatprep.subr.bf16.mxu1 %v2397_v38 }
 0x15b   : > { %2036 = vmatpush3.bf16.msra.mxu0 %v2398_v39  ;;  %2058 = vmatpush3.bf16.msra.mxu1 %v2399_v40 }
 0x211   : > { %v1238_v52 = vpop.f32.mrb[0].mxu0  ;;  %v1320_v53 = vpop.f32.mrb[0].mxu1 }
 0x212   : > { %v2065_v54 = vadd.f32 %v1238_v52, %v506_v48  ;;  %v2067_v55 = vadd.f32 %v1320_v53, %v514_v49  ;;  %v1240_v56 = vpop.f32.mrb[1].mxu0  ;;  %v1322_v57 = vpop.f32.mrb[1].mxu1 }
 0x213   : > { %v2066_v58 = vadd.f32 %v1240_v56, %v510_v50  ;;  %v2068_v59 = vadd.f32 %v1322_v57, %v518_v51  ;;  %v1242_v60 = vpop.f32.mrb[2].mxu0  ;;  %v1324_v61 = vpop.f32.mrb[2].mxu1 }
 0x214   : > { %v1327_v62 = vmax.f32 %v2065_v54, 0.0  ;;  %v1329_v63 = vmax.f32 %v2067_v55, 0.0  ;;  %v1243_v0 = vpop.f32.mrb[3].mxu0  ;;  %v1325_v1 = vpop.f32.mrb[3].mxu1 }
 0x215   : > { %v1328_v2 = vmax.f32 %v2066_v58, 0.0  ;;  %v1330_v3 = vmax.f32 %v2068_v59, 0.0 }
 0x216   : > { %v1332_v6 = vpack.c.bf16 %v1327_v62, %v1327_v62  ;;  %v1334_v7 = vpack.c.bf16 %v1329_v63, %v1329_v63 }
 0x217   : > { %v1333_v4 = vpack.c.bf16 %v1328_v2, %v1328_v2  ;;  %v1335_v5 = vpack.c.bf16 %v1330_v3, %v1330_v3 }
 0x219   : > { %1624 = vmatprep.mubr.bf16.mxu0 %v1333_v4  ;;  %1664 = vmatprep.mubr.bf16.mxu1 %v1335_v5 }
 0x21a   : > { %1625 = vmatmul.mubr.bf16.vlgmr.msra.gmra.mrb[4].mxu0 %v1332_v6  ;;  %1665 = vmatmul.mubr.bf16.vlgmr.msra.gmra.mrb[4].mxu1 %v1334_v7 }
 0x2ed   : > { %v2037_v8 = vpop.f32.mrb[4].mxu0  ;;  %v2059_v9 = vpop.f32.mrb[4].mxu1 }
 0x2ee   : > { %v2038_v10 = vpop.f32.mrb[5].mxu0  ;;  %v2060_v11 = vpop.f32.mrb[5].mxu1 }
 0x2ef   : > { %v2039_v12 = vadd.f32 %v2038_v10, %v2037_v8  ;;  %v2061_v13 = vadd.f32 %v2060_v11, %v2059_v9  ;;  %v2040_v14 = vpop.f32.mrb[6].mxu0  ;;  %v2062_v15 = vpop.f32.mrb[6].mxu1  ;;  %1677 = sbr.rel (%p2011_p12) target bundleno = 794 (0x31a), region = 68 }
 0x2f0   : > { %v2041_v17 = vpop.f32.mrb[7].mxu0  ;;  %v2063_v18 = vpop.f32.mrb[7].mxu1 }
 0x2f1   : > { %v1667_v19 = vadd.f32 %v2061_v13, %v2039_v12 }
 0x2f3   : > { %v1672_v20 = vadd.f32 %v1667_v19, %v1331_v16 }
 0x2f5   : > { %1673 = vst [vmem:[#allocation2] sm:$0xff] %v1672_v20 }
 0x2fc   : > { %v1678_v21 = vld [vmem:[#allocation2] sm:$0xff] }
 0x2fd   : > { %v1686_v23 = vadd.f32 %v2012_v22, %v1678_v21 }
 0x2ff   : > { %v2013_v24 = vmul.f32 -1.442695, %v1686_v23 }
 0x301   : > { %2400 = vpow2.f32 %v2013_v24 }
 0x30b   : > { %v2401_v25 = vpop.eup %2400 }
 0x30c   : > { %v1690_v26 = vadd.f32 1.0, %v2401_v25 }
 0x30e   : > { %2402 = vrcp.f32 %v1690_v26 }
 0x318   : > { %v2403_v27 = vpop.eup %2402 }
 0x319   : > { %1693 = vst [vmem:[#allocation12] sm:$0xff] %v2403_v27 }
 0x31a PF: > { %p2117_p11 = scmp.eq.s32.totalorder %s2715_s24, 7  ;;  %s2655_s26 = smov [#allocation12]  }
 0x31b   : > { %s1703_s8 = sshll.u32 %s2655_s26, 4  ;;  %s1704_s8 = int_to_ptr.vmem [resolvable:$true] %s1703_s8 }
 0x31c   : > { %s2550_s17 = scalar_lea.vmem %s1704_s8, 128  ;;  %p2557_p6 = scmp.lt.s32.totalorder %s1704_s8, %s1704_s8 }
 0x31d   : > { %p2551_p0 = scmp.ne.s32.totalorder %s1704_s8, %s2550_s17  ;;  %p2558_p8 = scmp.lt.s32.totalorder %s2550_s17, %s2550_s17 }
 0x31f   : > { %p2552_p7 = pnand %p2551_p0, %p2117_p11  ;;  %p2559_p13 = por %p2558_p8, %p2557_p6 }
 0x321   : > { %p2553_p10 = pneg %p2552_p7 }
 0x323   : > { %p2560_p3 = pnand %p2559_p13, %p2553_p10 }
 0x325   : > { %2563 = shalt.err (!%p2560_p3)
}
 0x326   : > { %s2564_s12 = scalar_lea.hbm %s3140_s5, 128 }
 0x327   : > { %p2565_p1 = scmp.ne.s32.totalorder %s3140_s5, %s2564_s12  ;;  %p2570_p5 = scmp.lt.u32.totalorder %s2564_s12, %s3140_s5 }
 0x329   : > { %p2566_p4 = pnand %p2565_p1, %p2117_p11 }
 0x32b   : > { %p2567_p9 = pneg %p2566_p4 }
 0x32d   : > { %p2572_p2 = pnand %p2570_p5, %p2567_p9 }
 0x32f   : > { %2575 = shalt.err (!%p2572_p2)
}
 0x330   : > { %2092 = dma.vmem_to_hbm [thread:$0]  (%p2117_p11), %s1704_s8, 128, %s3140_s5, [#allocation5]  }
 0x331   : > { %2617 = dma.done.wait (%p2117_p11), [#allocation5], 128  }
 0x332   : > { %2619 = vsyncadd (%p2117_p11), [#allocation5], 4294967168 }
 0x333 PF: > { %s23_s23 = sadd.s32 1, %s2642_s23   ;;  %s3179_s14 = sld [smem:[#allocation18_spill]] }
 0x334   : > { %p20_p12 = scmp.ge.s32.totalorder %s23_s23, 10   ;;  %s3180_s20 = sld [smem:[#allocation20_spill]] }
 0x335   : > { %s3181_s10 = sld [smem:[#allocation19_spill]]  ;;  %s3182_s18 = smov %s2626_s19 }
 0x336   : > { %s3184_s21 = smov %s2638_s22  ;;  %22 = sbr.rel (!%p20_p12) target bundleno = 11 (0xb), region = 120 }
 0x339   : > { %s3183_s19 = smov %s3179_s14 }
 0x33b   : > { %s3185_s22 = smov %s3181_s10 }
 0x33d   :  { %1716 = vsyncpa [#allocation4], 1 }
 0x33e   :  { %1718 = vsyncpa [#allocation4 + $0x1], 1 }
 0x33f   :  { %1719 = vsyncpa [#allocation7], 1 }
 0x340   :  { %1721 = vsyncpa [#allocation7 + $0x1], 1 }
 0x341   :  { %1722 = vsyncpa [#allocation10], 1 }
 0x342   :  { %1724 = vsyncpa [#allocation10 + $0x1], 1 }
 0x343   :  { %1725 = vsyncpa [#allocation5], 1 }
 0x344   :  { %1727 = vsyncpa [#allocation5 + $0x1], 1 }

</bundles_post_ra>
